<compile_context>
chip_gen: v5e
topology: v5e:2x2
jax: 0.10.0
libtpu: 0.0.40
codegen_flags: <defaults>
</compile_context>

<pallas_src>
import functools

import jax
import jax.numpy as jnp
from jax.experimental import pallas as pl
from jax.experimental.pallas import tpu as pltpu


def encoder_kernel(x_ref, w1_ref, b1_ref, w2_ref, b2_ref, out_ref, *,
                   d_latent, period):
    # Layer 1: MXU matmul (f32 accumulation) + f32 bias + f32 tanh (EUP).
    h = jnp.tanh(
        jnp.dot(x_ref[...], w1_ref[...], preferred_element_type=jnp.float32)
        + b1_ref[...]
    )
    # Layer 2: cast activations to the weight dtype (bf16 MXU path on v6e/v7x).
    h = h.astype(w2_ref.dtype)
    out = (
        jnp.dot(h, w2_ref[...], preferred_element_type=jnp.float32) + b2_ref[...]
    )
    # Fused lane-dense output.  Within each packed group of `period` lanes,
    # lanes [0, d_latent) -> tanh (mu), lanes [d_latent, period) -> exp (sigma).
    # (Unpacked case: period == output width, so this reduces to col < d_latent.)
    col = jax.lax.broadcasted_iota(jnp.int32, out.shape, 1)
    is_mu = (col % period) < d_latent
    out_ref[...] = jnp.where(is_mu, jnp.tanh(out), jnp.exp(out)).astype(
        out_ref.dtype
    )


def encoder_forward(x, w1, b1, w2, b2, d_latent, *, compute_dtype=jnp.float32,
                    out_dtype=None, target_tile_bytes=2 << 20):
    """mu, sigma = Encoder(x).  w1:(d_data,d_hidden) w2:(d_hidden,2*d_latent)."""
    B, d_data = x.shape
    d_hidden = w1.shape[1]
    two_lat = w2.shape[1]
    assert two_lat == 2 * d_latent

    if out_dtype is None:
        out_dtype = jnp.float32 if compute_dtype == jnp.float32 else compute_dtype

    # ---- Lane-dense row packing -------------------------------------------
    # Pack `pack` batch rows per 128-lane kernel row when the feature dims are
    # narrow; weights become block-diagonal (kron(I, W)), biases are tiled.
    max_feat = max(d_data, d_hidden, two_lat)
    pack = 1
    if max_feat < 128 and B > 1:
        cand = max(128 // max_feat, 1)
        while cand > 1 and B % cand != 0:
            cand -= 1
        pack = cand

    xg = x.astype(compute_dtype)
    if pack > 1:
        eye = jnp.eye(pack, dtype=compute_dtype)
        w1c = jnp.kron(eye, w1.astype(compute_dtype))           # (p*d_data, p*d_hidden)
        w2c = jnp.kron(eye, w2.astype(compute_dtype))           # (p*d_hidden, p*two_lat)
        b1f = jnp.tile(b1.astype(jnp.float32), pack).reshape(1, pack * d_hidden)
        b2f = jnp.tile(b2.astype(jnp.float32), pack).reshape(1, pack * two_lat)
        xg = xg.reshape(B // pack, pack * d_data)                # free, contiguous
    else:
        w1c = w1.astype(compute_dtype)
        w2c = w2.astype(compute_dtype)
        b1f = b1.reshape(1, d_hidden).astype(jnp.float32)
        b2f = b2.reshape(1, two_lat).astype(jnp.float32)

    n_rows, in_w = xg.shape
    hid_w = w1c.shape[1]
    out_w = w2c.shape[1]

    # ---- Batch tile selection ---------------------------------------------
    # Aim for ~target_tile_bytes per x tile (output tile is comparable), keeping
    # double-buffered x+out well under v5e's 16 MiB default scoped VMEM.
    bytes_per_row = in_w * jnp.dtype(compute_dtype).itemsize
    tb_cap = max(8, min((target_tile_bytes // bytes_per_row) // 8 * 8, 32768))
    if n_rows <= tb_cap:
        tb = n_rows                      # single full-extent block (no 8-align needed)
    else:
        tb = tb_cap                      # multiple of 8; last block may be ragged
    grid = (pl.cdiv(n_rows, tb),)

    fused = pl.pallas_call(
        functools.partial(encoder_kernel, d_latent=d_latent, period=two_lat),
        out_shape=jax.ShapeDtypeStruct((n_rows, out_w), out_dtype),
        grid=grid,
        in_specs=[
            # x tiled over the batch grid axis (ragged final block is masked).
            pl.BlockSpec((tb, in_w), lambda i: (i, 0)),
            # Weights/biases resident in VMEM across all batch tiles.
            pl.BlockSpec((in_w, hid_w), lambda i: (0, 0)),
            pl.BlockSpec((1, hid_w), lambda i: (0, 0)),
            pl.BlockSpec((hid_w, out_w), lambda i: (0, 0)),
            pl.BlockSpec((1, out_w), lambda i: (0, 0)),
        ],
        out_specs=pl.BlockSpec((tb, out_w), lambda i: (i, 0)),
        compiler_params=pltpu.CompilerParams(
            dimension_semantics=("parallel",),  # shard batch tiles across TCs (v7x)
        ),
    )(xg, w1c, b1f, w2c, b2f)

    if pack > 1:
        fused = fused.reshape(B, two_lat)   # free, contiguous reshape
    # Lane slices at d_latent; if both feed one consumer, prefer using `fused`
    # directly at the point of use to avoid extra copies.
    mu = fused[:, :d_latent]
    sigma = fused[:, d_latent:]
    return mu, sigma


def _reference(x, w1, b1, w2, b2, d_latent):
    h = jnp.tanh(x @ w1 + b1.reshape(1, -1))
    out = h @ w2 + b2.reshape(1, -1)
    return jnp.tanh(out[:, :d_latent]), jnp.exp(out[:, d_latent:])


if __name__ == "__main__":
    # Small shapes consistent with the module's forward.
    B, d_data, d_hidden, d_latent = 8, 32, 32, 16

    key = jax.random.PRNGKey(0)
    kx, k1, kb1, k2, kb2, kx2, kx3 = jax.random.split(key, 7)

    x = jax.random.normal(kx, (B, d_data), dtype=jnp.float32)
    # Deterministic synthetic parameters, stored as (in, out).
    w1 = jax.random.normal(k1, (d_data, d_hidden), dtype=jnp.float32) * 0.1
    b1 = jax.random.normal(kb1, (d_hidden,), dtype=jnp.float32) * 0.1
    w2 = jax.random.normal(k2, (d_hidden, 2 * d_latent), dtype=jnp.float32) * 0.1
    b2 = jax.random.normal(kb2, (2 * d_latent,), dtype=jnp.float32) * 0.1

    # f32, packed (B divisible by 4) -> tight tolerance.
    mu, sigma = encoder_forward(x, w1, b1, w2, b2, d_latent)
    mu = jax.block_until_ready(mu)
    sigma = jax.block_until_ready(sigma)
    mu_ref, sigma_ref = _reference(x, w1, b1, w2, b2, d_latent)
    assert jnp.allclose(mu, mu_ref, atol=1e-5, rtol=1e-5), "mu mismatch (f32)"
    assert jnp.allclose(sigma, sigma_ref, atol=1e-5, rtol=1e-5), "sigma mismatch (f32)"

    # Multi-tile + ragged final block (tiny tile budget to force a ragged grid).
    B2 = 100
    x2 = jax.random.normal(kx2, (B2, d_data), dtype=jnp.float32)
    mu2, sigma2 = encoder_forward(x2, w1, b1, w2, b2, d_latent,
                                  target_tile_bytes=4096)
    mu2 = jax.block_until_ready(mu2)
    sigma2 = jax.block_until_ready(sigma2)
    mu2_ref, sigma2_ref = _reference(x2, w1, b1, w2, b2, d_latent)
    assert jnp.allclose(mu2, mu2_ref, atol=1e-5, rtol=1e-5), "mu mismatch (ragged)"
    assert jnp.allclose(sigma2, sigma2_ref, atol=1e-5, rtol=1e-5), "sigma mismatch (ragged)"

    # Unpacked fallback path (B not divisible by the pack factor).
    B3 = 7
    x3 = jax.random.normal(kx3, (B3, d_data), dtype=jnp.float32)
    mu3, sigma3 = encoder_forward(x3, w1, b1, w2, b2, d_latent)
    mu3 = jax.block_until_ready(mu3)
    sigma3 = jax.block_until_ready(sigma3)
    mu3_ref, sigma3_ref = _reference(x3, w1, b1, w2, b2, d_latent)
    assert jnp.allclose(mu3, mu3_ref, atol=1e-5, rtol=1e-5), "mu mismatch (unpacked)"
    assert jnp.allclose(sigma3, sigma3_ref, atol=1e-5, rtol=1e-5), "sigma mismatch (unpacked)"

    # bf16 MXU-operand + bf16-output path (v5e/v6e/v7x-friendly); loose tol.
    mu4, sigma4 = encoder_forward(x, w1, b1, w2, b2, d_latent,
                                  compute_dtype=jnp.bfloat16)
    mu4 = jax.block_until_ready(mu4)
    sigma4 = jax.block_until_ready(sigma4)
    assert jnp.allclose(mu4.astype(jnp.float32), mu_ref, atol=3e-2, rtol=3e-2), \
        "mu mismatch (bf16)"
    assert jnp.allclose(sigma4.astype(jnp.float32), sigma_ref, atol=3e-2, rtol=3e-2), \
        "sigma mismatch (bf16)"

    print("KERNEL_OK")
</pallas_src>

<mosaic_0001>
module attributes {stable_mosaic.version = 11 : i64} {
  func.func @encoder_kernel(%arg0: i32, %arg1: memref<2x128xf32, #tpu.memory_space<vmem>>, %arg2: memref<128x128xf32, #tpu.memory_space<vmem>>, %arg3: memref<1x128xf32, #tpu.memory_space<vmem>>, %arg4: memref<128x128xf32, #tpu.memory_space<vmem>>, %arg5: memref<1x128xf32, #tpu.memory_space<vmem>>, %arg6: memref<2x128xf32, #tpu.memory_space<vmem>>) attributes {dimension_semantics = [#tpu.dimension_semantics<parallel>], iteration_bounds = array<i64: 1>, scalar_prefetch = 0 : i64, scratch_operands = 0 : i64, tpu.core_type = #tpu.core_type<tc>, window_params = [{transform_indices = @transform_0, window_bounds = array<i64: 2, 128>}, {pipeline_mode = #tpu.pipeline_mode<synchronous>, transform_indices = @transform_1, window_bounds = array<i64: 128, 128>}, {pipeline_mode = #tpu.pipeline_mode<synchronous>, transform_indices = @transform_2, window_bounds = array<i64: 1, 128>}, {pipeline_mode = #tpu.pipeline_mode<synchronous>, transform_indices = @transform_3, window_bounds = array<i64: 128, 128>}, {pipeline_mode = #tpu.pipeline_mode<synchronous>, transform_indices = @transform_4, window_bounds = array<i64: 1, 128>}, {transform_indices = @transform_5, window_bounds = array<i64: 2, 128>}]} {
    %c0 = arith.constant 0 : index
    %c0_0 = arith.constant 0 : index
    %0 = vector.load %arg1[%c0, %c0_0] : memref<2x128xf32, #tpu.memory_space<vmem>>, vector<2x128xf32>
    %c0_1 = arith.constant 0 : index
    %c0_2 = arith.constant 0 : index
    %1 = vector.load %arg2[%c0_1, %c0_2] : memref<128x128xf32, #tpu.memory_space<vmem>>, vector<128x128xf32>
    %cst = arith.constant dense<0.000000e+00> : vector<2x128xf32>
    %2 = tpu.matmul %0, %1, %cst {dimension_numbers = #tpu.dot_dimension_numbers<[1], [0], [0], [1], [0, 0, 1, 1], [], []>} : vector<2x128xf32>, vector<128x128xf32>, vector<2x128xf32> -> vector<2x128xf32>
    %c0_3 = arith.constant 0 : index
    %c0_4 = arith.constant 0 : index
    %3 = vector.load %arg3[%c0_3, %c0_4] : memref<1x128xf32, #tpu.memory_space<vmem>>, vector<1x128xf32>
    %4 = vector.broadcast %3 : vector<1x128xf32> to vector<2x128xf32>
    %5 = arith.addf %2, %4 : vector<2x128xf32>
    %6 = math.tanh %5 : vector<2x128xf32>
    %c0_5 = arith.constant 0 : index
    %c0_6 = arith.constant 0 : index
    %7 = vector.load %arg4[%c0_5, %c0_6] : memref<128x128xf32, #tpu.memory_space<vmem>>, vector<128x128xf32>
    %cst_7 = arith.constant dense<0.000000e+00> : vector<2x128xf32>
    %8 = tpu.matmul %6, %7, %cst_7 {dimension_numbers = #tpu.dot_dimension_numbers<[1], [0], [0], [1], [0, 0, 1, 1], [], []>} : vector<2x128xf32>, vector<128x128xf32>, vector<2x128xf32> -> vector<2x128xf32>
    %c0_8 = arith.constant 0 : index
    %c0_9 = arith.constant 0 : index
    %9 = vector.load %arg5[%c0_8, %c0_9] : memref<1x128xf32, #tpu.memory_space<vmem>>, vector<1x128xf32>
    %10 = vector.broadcast %9 : vector<1x128xf32> to vector<2x128xf32>
    %11 = arith.addf %8, %10 : vector<2x128xf32>
    %12 = tpu.iota {dimensions = array<i32: 1>} : vector<2x128xi32>
    %c32_i32 = arith.constant 32 : i32
    %c0_i32 = arith.constant 0 : i32
    %13 = arith.cmpi eq, %c32_i32, %c0_i32 : i32
    %c1_i32 = arith.constant 1 : i32
    %14 = arith.select %13, %c1_i32, %c32_i32 : i32
    %15 = vector.broadcast %14 : i32 to vector<2x128xi32>
    %16 = arith.remsi %12, %15 : vector<2x128xi32>
    %c0_i32_10 = arith.constant 0 : i32
    %17 = vector.broadcast %c0_i32_10 : i32 to vector<2x128xi32>
    %18 = arith.cmpi ne, %16, %17 : vector<2x128xi32>
    %c0_i32_11 = arith.constant 0 : i32
    %19 = vector.broadcast %c0_i32_11 : i32 to vector<2x128xi32>
    %20 = arith.cmpi slt, %16, %19 : vector<2x128xi32>
    %c0_i32_12 = arith.constant 0 : i32
    %21 = arith.cmpi slt, %14, %c0_i32_12 : i32
    %22 = vector.broadcast %21 : i1 to vector<2x128xi1>
    %23 = vector.broadcast %22 : vector<2x128xi1> to vector<2x128xi1>
    %24 = arith.xori %20, %23 : vector<2x128xi1>
    %25 = arith.andi %24, %18 : vector<2x128xi1>
    %26 = vector.broadcast %14 : i32 to vector<2x128xi32>
    %27 = arith.addi %16, %26 : vector<2x128xi32>
    %28 = arith.select %25, %27, %16 : vector<2x128xi1>, vector<2x128xi32>
    %c16_i32 = arith.constant 16 : i32
    %29 = vector.broadcast %c16_i32 : i32 to vector<2x128xi32>
    %30 = arith.cmpi slt, %28, %29 : vector<2x128xi32>
    %31 = math.tanh %11 : vector<2x128xf32>
    %32 = math.exp %11 : vector<2x128xf32>
    %33 = arith.select %30, %31, %32 : vector<2x128xi1>, vector<2x128xf32>
    %c0_13 = arith.constant 0 : index
    %c0_14 = arith.constant 0 : index
    %34 = vector.load %arg6[%c0_13, %c0_14] : memref<2x128xf32, #tpu.memory_space<vmem>>, vector<2x128xf32>
    tpu.vector_store %arg6[%c0_13, %c0_14], %33 {strides = array<i32>} : memref<2x128xf32, #tpu.memory_space<vmem>>, vector<2x128xf32>,
    return
  }
  func.func @transform_0(%arg0: i32) -> (i32, i32) {
    %c0_i32 = arith.constant 0 : i32
    %c0_i32_0 = arith.constant 0 : i32
    return %arg0, %c0_i32 : i32, i32
  }
  func.func @transform_1(%arg0: i32) -> (i32, i32) {
    %c0_i32 = arith.constant 0 : i32
    %c0_i32_0 = arith.constant 0 : i32
    %c0_i32_1 = arith.constant 0 : i32
    return %c0_i32, %c0_i32_0 : i32, i32
  }
  func.func @transform_2(%arg0: i32) -> (i32, i32) {
    %c0_i32 = arith.constant 0 : i32
    %c0_i32_0 = arith.constant 0 : i32
    %c0_i32_1 = arith.constant 0 : i32
    return %c0_i32, %c0_i32_0 : i32, i32
  }
  func.func @transform_3(%arg0: i32) -> (i32, i32) {
    %c0_i32 = arith.constant 0 : i32
    %c0_i32_0 = arith.constant 0 : i32
    %c0_i32_1 = arith.constant 0 : i32
    return %c0_i32, %c0_i32_0 : i32, i32
  }
  func.func @transform_4(%arg0: i32) -> (i32, i32) {
    %c0_i32 = arith.constant 0 : i32
    %c0_i32_0 = arith.constant 0 : i32
    %c0_i32_1 = arith.constant 0 : i32
    return %c0_i32, %c0_i32_0 : i32, i32
  }
  func.func @transform_5(%arg0: i32) -> (i32, i32) {
    %c0_i32 = arith.constant 0 : i32
    %c0_i32_0 = arith.constant 0 : i32
    return %arg0, %c0_i32 : i32, i32
  }
}

</mosaic_0001>

<bundles_post_ra>
// kernel: tpu_custom_call.1
= control target key start
LH: loop header
LB: loop body
LE: loop exit
PB: predicated region body
PF: predicated region fallthrough
CT: control target
= control target key end

     0   :  { %10 = vsyncpa [#allocation3], 0  ;;  %s356_s0 = inlined_call_operand.hbm [shape: f32[2,128], index: 0, kind: input, shape index: {}]   ;;  %s357_s1 = inlined_call_operand.hbm [shape: f32[128,128], index: 1, kind: input, shape index: {}]   ;;  %s358_s2 = inlined_call_operand.vmem [shape: f32[1,128], index: 2, kind: input, shape index: {}]   ;;  %s359_s3 = inlined_call_operand.hbm [shape: f32[128,128], index: 3, kind: input, shape index: {}]   ;;  %s360_s4 = inlined_call_operand.vmem [shape: f32[1,128], index: 4, kind: input, shape index: {}]   ;;  %s361_s5 = inlined_call_operand.hbm [shape: f32[2,128], index: 5, kind: output, shape index: {}]  }
   0x1   :  { %11 = vsyncpa [#allocation6], 0  ;;  %s28_s20 = sshll.u32 %s357_s1, 4  ;;  %s29_s20 = int_to_ptr.hbm [resolvable:$true] %s28_s20 }
   0x2   :  { %12 = vsyncpa [#allocation4], 0  ;;  %s302_s21 = smov [#allocation5]   ;;  %s18_s25 = sshll.u32 %s356_s0, 4  ;;  %s19_s25 = int_to_ptr.hbm [resolvable:$true] %s18_s25 }
   0x3   :  { %s30_s22 = sshll.u32 %s302_s21, 4  ;;  %s303_s26 = smov 128   ;;  %s31_s22 = int_to_ptr.vmem [resolvable:$true] %s30_s22 }
   0x4   :  { %s304_s27 = smov 8   ;;  %s305_s28 = smov [#allocation2]  }
   0x5   :  { %36 = dma.hbm_to_vmem [thread:$0]  %s29_s20, 2048, %s31_s22, [#allocation6], %s303_s26, %s303_s26, %s304_s27  }
   0x6   :  { %s20_s29 = sshll.u32 %s305_s28, 4  ;;  %s43_s7 = sshll.u32 %s359_s3, 4  ;;  %s21_s29 = int_to_ptr.vmem [resolvable:$true] %s20_s29  ;;  %s44_s7 = int_to_ptr.hbm [resolvable:$true] %s43_s7 }
   0x7   :  { %23 = dma.hbm_to_vmem [thread:$0]  %s19_s25, 32, %s21_s29, [#allocation3]  }
   0x8   :  { %s306_s1 = smov [#allocation7]  }
   0x9   :  { %s45_s8 = sshll.u32 %s306_s1, 4  ;;  %s46_s8 = int_to_ptr.vmem [resolvable:$true] %s45_s8 }
   0xa   :  { %51 = dma.hbm_to_vmem [thread:$0]  %s44_s7, 2048, %s46_s8, [#allocation6], %s303_s26, %s303_s26, %s304_s27  }
   0xb   :  { %296 = dma.done.wait [#allocation3], 32  }
   0xc   :  { %297 = vsyncadd [#allocation3], 4294967264 }
   0xd   :  { %298 = dma.done.wait [#allocation6], 4096  }
   0xe   :  { %299 = vsyncadd [#allocation6], 4294963200  ;;  %v82_v0 = vld [vmem:[#allocation5 + $0x78] sm:$0xff]  ;;  %v81_v1 = vld [vmem:[#allocation5 + $0x70] sm:$0xff]  ;;  %v148_v38 = vlaneseq  ;;  %s307_s11 = smov [#allocation8]   ;;  %s175_s14 = sshll.u32 %s361_s5, 4  ;;  %s176_s14 = int_to_ptr.hbm [resolvable:$true] %s175_s14 }
   0xf   :  { %87 = vmatpush.msra.mxu0 %v82_v0  ;;  %v80_v2 = vld [vmem:[#allocation5 + $0x68] sm:$0xff]  ;;  %v79_v3 = vld [vmem:[#allocation5 + $0x60] sm:$0xff]  ;;  %v123_v4 = vld [vmem:[#allocation7 + $0x78] sm:$0xff]  ;;  %s173_s12 = sshll.u32 %s307_s11, 4  ;;  %s174_s12 = int_to_ptr.vmem [resolvable:$true] %s173_s12 }
  0x10   :  { %v78_v5 = vld [vmem:[#allocation5 + $0x58] sm:$0xff]  ;;  %128 = vmatpush.msra.mxu1 %v123_v4  ;;  %v122_v6 = vld [vmem:[#allocation7 + $0x70] sm:$0xff]  ;;  %v121_v7 = vld [vmem:[#allocation7 + $0x68] sm:$0xff]  ;;  %v149_v41 = vand.u32 127, %v148_v38 }
  0x11   :  { %88 = vmatpush.msra.mxu0 %v81_v1  ;;  %v77_v8 = vld [vmem:[#allocation5 + $0x50] sm:$0xff]  ;;  %v120_v9 = vld [vmem:[#allocation7 + $0x60] sm:$0xff]  ;;  %v76_v10 = vld [vmem:[#allocation5 + $0x48] sm:$0xff] }
  0x12   :  { %129 = vmatpush.msra.mxu1 %v122_v6  ;;  %v119_v11 = vld [vmem:[#allocation7 + $0x58] sm:$0xff]  ;;  %v75_v12 = vld [vmem:[#allocation5 + $0x40] sm:$0xff]  ;;  %v118_v13 = vld [vmem:[#allocation7 + $0x50] sm:$0xff]  ;;  %v154_v43 = vand.u32 31, %v149_v41 }
  0x13   :  { %89 = vmatpush.msra.mxu0 %v80_v2  ;;  %v74_v14 = vld [vmem:[#allocation5 + $0x38] sm:$0xff]  ;;  %v117_v15 = vld [vmem:[#allocation7 + $0x48] sm:$0xff]  ;;  %v73_v16 = vld [vmem:[#allocation5 + $0x30] sm:$0xff] }
  0x14   :  { %130 = vmatpush.msra.mxu1 %v121_v7  ;;  %v116_v17 = vld [vmem:[#allocation7 + $0x40] sm:$0xff]  ;;  %v72_v18 = vld [vmem:[#allocation5 + $0x28] sm:$0xff]  ;;  %v115_v19 = vld [vmem:[#allocation7 + $0x38] sm:$0xff]  ;;  %vm162_vm0 = vcmp.lt.s32.totalorder %v154_v43, 16 }
  0x15   :  { %90 = vmatpush.msra.mxu0 %v79_v3  ;;  %v71_v20 = vld [vmem:[#allocation5 + $0x20] sm:$0xff]  ;;  %v114_v21 = vld [vmem:[#allocation7 + $0x30] sm:$0xff]  ;;  %v70_v22 = vld [vmem:[#allocation5 + $0x18] sm:$0xff] }
  0x16   :  { %131 = vmatpush.msra.mxu1 %v120_v9  ;;  %v113_v23 = vld [vmem:[#allocation7 + $0x28] sm:$0xff]  ;;  %v69_v24 = vld [vmem:[#allocation5 + $0x10] sm:$0xff]  ;;  %v67_v26 = vld [vmem:[#allocation5] sm:$0xff] }
  0x17   :  { %91 = vmatpush.msra.mxu0 %v78_v5  ;;  %v68_v25 = vld [vmem:[#allocation5 + $0x8] sm:$0xff]  ;;  %v66_v27 = vld [vmem:[#allocation2] sm:$0x3]  ;;  %v112_v28 = vld [vmem:[#allocation7 + $0x20] sm:$0xff] }
  0x18   :  { %132 = vmatpush.msra.mxu1 %v119_v11  ;;  %v111_v29 = vld [vmem:[#allocation7 + $0x18] sm:$0xff]  ;;  %v110_v30 = vld [vmem:[#allocation7 + $0x10] sm:$0xff]  ;;  %v109_v31 = vld [vmem:[#allocation7 + $0x8] sm:$0xff] }
  0x19   :  { %92 = vmatpush.msra.mxu0 %v77_v8  ;;  %v108_v32 = vld [vmem:[#allocation7] sm:$0xff]  ;;  %v192_v33 = vld [vmem:[%s358_s2] ss:$0 sm:$0xff] }
  0x1a   :  { %133 = vmatpush.msra.mxu1 %v118_v13  ;;  %v193_v37 = vld [vmem:[%s360_s4] ss:$0 sm:$0xff] }
  0x1b   :  { %93 = vmatpush.msra.mxu0 %v76_v10 }
  0x1c   :  { %134 = vmatpush.msra.mxu1 %v117_v15 }
  0x1d   :  { %94 = vmatpush.msra.mxu0 %v75_v12 }
  0x1e   :  { %135 = vmatpush.msra.mxu1 %v116_v17 }
  0x1f   :  { %95 = vmatpush.msra.mxu0 %v74_v14 }
  0x20   :  { %136 = vmatpush.msra.mxu1 %v115_v19 }
  0x21   :  { %96 = vmatpush.msra.mxu0 %v73_v16 }
  0x22   :  { %137 = vmatpush.msra.mxu1 %v114_v21 }
  0x23   :  { %97 = vmatpush.msra.mxu0 %v72_v18 }
  0x24   :  { %138 = vmatpush.msra.mxu1 %v113_v23 }
  0x25   :  { %98 = vmatpush.msra.mxu0 %v71_v20 }
  0x26   :  { %139 = vmatpush.msra.mxu1 %v112_v28 }
  0x27   :  { %99 = vmatpush.msra.mxu0 %v70_v22 }
  0x28   :  { %140 = vmatpush.msra.mxu1 %v111_v29 }
  0x29   :  { %100 = vmatpush.msra.mxu0 %v69_v24 }
  0x2a   :  { %141 = vmatpush.msra.mxu1 %v110_v30 }
  0x2b   :  { %101 = vmatpush.msra.mxu0 %v68_v25 }
  0x2c   :  { %142 = vmatpush.msra.mxu1 %v109_v31 }
  0x2d   :  { %102 = vmatpush.msra.mxu0 %v67_v26 }
  0x2e   :  { %103 = vmatmul.f32.vlgmr.msra.gmra.mxu0 %v66_v27  ;;  %143 = vmatpush.msra.mxu1 %v108_v32 }
  0xab   :  { %v104_v34 = vpop.f32.mrf.mxu0 }
  0xac   :  { %v105_v35 = vadd.f32 %v192_v33, %v104_v34 }
  0xae   :  { %194 = vtanh.f32 %v105_v35 }
  0xb4   :  { %v195_v36 = vpop.eup %194 }
  0xb5   :  { %144 = vmatmul.f32.vlgmr.msra.gmra.mxu1 %v195_v36 }
 0x132   :  { %v145_v39 = vpop.f32.mrf.mxu1 }
 0x133   :  { %v146_v40 = vadd.f32 %v193_v37, %v145_v39 }
 0x135   :  { %v164_v42 = vmul.f32 1.442695, %v146_v40  ;;  %196 = vtanh.f32 %v146_v40 }
 0x137   :  { %198 = vpow2.f32 %v164_v42 }
 0x13b   :  { %v197_v44 = vpop.eup %196 }
 0x13d   :  { %v199_v45 = vpop.eup %198 }
 0x13e   :  { %v166_v46 = vsel %vm162_vm0, %v197_v44, %v199_v45 }
 0x13f   :  { %167 = vst [vmem:[#allocation8] sm:$0x3] %v166_v46 }
 0x140   :  { %178 = dma.vmem_to_hbm [thread:$0]  %s174_s12, 32, %s176_s14, [#allocation4]  }
 0x141   :  { %300 = dma.done.wait [#allocation4], 32  }
 0x142   :  { %301 = vsyncadd [#allocation4], 4294967264 }
 0x143   :  { %183 = vsyncpa [#allocation3], 1 }
 0x144   :  { %184 = vsyncpa [#allocation6], 1 }
 0x145   :  { %185 = vsyncpa [#allocation4], 1 }

</bundles_post_ra>
